<compile_context>
chip_gen: v7x
topology: tpu7x:2x2x1
jax: 0.10.0
libtpu: 0.0.40
codegen_flags: <defaults>
</compile_context>

<pallas_src>
import math

import jax
import jax.numpy as jnp
from jax.experimental import pallas as pl
from jax.experimental.pallas import tpu as pltpu


# ---------------------------------------------------------------------------
# Table construction (mirrors the PyTorch RotaryEmbedding.__init__).
# ---------------------------------------------------------------------------
def make_rotary_tables(dim: int, size: int, ratio: float = 0.5, theta: float = 10000.0):
    base = theta ** (-jnp.arange(0, dim, 2)[: dim // 2].astype(jnp.float32) / dim)
    base = jnp.repeat(base, 2) * ratio                       # (dim,)
    ys, xs = jnp.meshgrid(jnp.arange(size), jnp.arange(size), indexing="ij")
    coords = jnp.stack((ys, xs), axis=-1).astype(jnp.float32).reshape(size * size, 2)
    freqs = coords[..., None] * base                          # (N, 2, dim)
    freqs = freqs.reshape(size * size, 2 * dim)               # (N, 2*dim)
    return jnp.cos(freqs), jnp.sin(freqs)


def prepare_rotary_tables(freqs_cos, freqs_sin, dtype=jnp.float32):
    """One-time (per model) preprocessing: sign-fold the sin table.

    sin_signed[:, 2j]   = +sin[:, 2j]    (multiplies x[:, 2j+1])
    sin_signed[:, 2j+1] = -sin[:, 2j+1]  (multiplies x[:, 2j])
    """
    D = freqs_sin.shape[-1]
    sign = jnp.where((jnp.arange(D) % 2) == 0, 1.0, -1.0)
    return freqs_cos.astype(dtype), (freqs_sin * sign).astype(dtype)


# ---------------------------------------------------------------------------
# Kernel body: 3 muls + 2 adds + 2 lane rolls + 1 parity select per block.
# ---------------------------------------------------------------------------
def _rope_kernel(cos_ref, sin_ref, x_ref, o_ref):
    x = x_ref[...]                      # (tn, W) block, batch dim squeezed
    w = x.shape[-1]
    # fwd[i] = x[(i+1) % W]  (consumed only on even lanes)
    # bwd[i] = x[(i-1) % W]  (consumed only on odd lanes)
    # NOTE: shift=w-1 is the +1-neighbour rotate; wraparound lanes are never
    # selected by the parity mask, so fold/pad seams stay correct.
    fwd = pltpu.roll(x, shift=w - 1, axis=1)
    bwd = pltpu.roll(x, shift=1, axis=1)
    parity = jax.lax.broadcasted_iota(jnp.int32, x.shape, 1) & 1
    partner = jnp.where(parity == 0, fwd, bwd)
    o_ref[...] = x * cos_ref[...] + partner * sin_ref[...]


# ---------------------------------------------------------------------------
# Tiling helpers.
# ---------------------------------------------------------------------------
def _cdiv(a: int, b: int) -> int:
    return -(-a // b)


def _sublane_multiple(dtype) -> int:
    bits = jnp.dtype(dtype).itemsize * 8
    if bits >= 32:
        return 8
    if bits == 16:
        return 16
    return 32


def _choose_fold(N: int, D: int, w_max: int = 2048) -> int:
    """Fold factor k: W = k*D must be a multiple of 128; prefer wide W."""
    k0 = 128 // math.gcd(D, 128)        # smallest lane-dense fold
    if k0 * D > w_max:
        return k0
    cands = list(range(k0, w_max // D + 1, k0))
    # Largest k that divides N (no padding needed).
    for k in reversed(cands):
        if N % k == 0:
            return k
    # Otherwise the widest k whose padding overhead is <= N/16.
    for k in reversed(cands):
        if ((-N) % k) * 16 <= N:
            return k
    return k0


# ---------------------------------------------------------------------------
# Wrapper.
# ---------------------------------------------------------------------------
def rotary_embedding(x, freqs_cos, freqs_sin_signed, *,
                     target_block_bytes: int = 2 * 1024 * 1024):
    """x: (B, N, D); freqs_cos / freqs_sin_signed: (N, D).  Returns (B, N, D).

    `freqs_sin_signed` is the sign-folded sin table from prepare_rotary_tables.
    """
    B, N, D = x.shape
    assert D % 2 == 0
    assert freqs_cos.shape == (N, D) and freqs_sin_signed.shape == (N, D)

    dt = x.dtype
    itemsize = jnp.dtype(dt).itemsize
    sub = _sublane_multiple(dt)

    # ---- lane folding: (N, D) -> (Nf, W) with W a multiple of 128 ----------
    k = _choose_fold(N, D)
    W = k * D

    # ---- row tiling: ~target_block_bytes per block, sublane-aligned --------
    nf_needed = _cdiv(N, k)
    tn_cap = max(sub, (target_block_bytes // (W * itemsize)) // sub * sub)
    if nf_needed <= tn_cap:
        n_tiles, tn = 1, nf_needed                    # block == full row dim
    else:
        n_tiles = _cdiv(nf_needed, tn_cap)
        tn = _cdiv(_cdiv(nf_needed, n_tiles), sub) * sub   # balanced tiles
    Nf = n_tiles * tn
    N_pad = Nf * k

    # ---- padding (keeps the unmasked lane-dense path; sliced off after) ----
    cos_t = freqs_cos.astype(dt)
    sin_t = freqs_sin_signed.astype(dt)
    if N_pad != N:
        pad = N_pad - N
        x_p = jnp.pad(x, ((0, 0), (0, pad), (0, 0)))
        cos_t = jnp.pad(cos_t, ((0, pad), (0, 0)))
        sin_t = jnp.pad(sin_t, ((0, pad), (0, 0)))
    else:
        x_p = x

    cos_f = cos_t.reshape(Nf, W)
    sin_f = sin_t.reshape(Nf, W)
    x_f = x_p.reshape(B, Nf, W)

    # ---- grid: row tiles outer (parallel), batch inner (table DMA reuse) ---
    grid = (n_tiles, B)
    if n_tiles == 1 and B > 1:
        semantics = ("arbitrary", "parallel")   # keep both v7x cores busy
    else:
        semantics = ("parallel", "arbitrary")

    cost = pl.CostEstimate(
        flops=6 * B * N * D,
        transcendentals=0,
        bytes_accessed=(2 * B * N * D + 2 * N * D) * itemsize,
    )

    out = pl.pallas_call(
        _rope_kernel,
        out_shape=jax.ShapeDtypeStruct((B, Nf, W), dt),
        grid_spec=pltpu.PrefetchScalarGridSpec(
            num_scalar_prefetch=0,
            grid=grid,
            in_specs=[
                pl.BlockSpec((tn, W), lambda i, b: (i, 0)),          # cos (shared)
                pl.BlockSpec((tn, W), lambda i, b: (i, 0)),          # sin_signed (shared)
                pl.BlockSpec((None, tn, W), lambda i, b: (b, i, 0)), # x (2D block)
            ],
            out_specs=pl.BlockSpec((None, tn, W), lambda i, b: (b, i, 0)),
        ),
        compiler_params=pltpu.CompilerParams(
            dimension_semantics=semantics,
            vmem_limit_bytes=48 * 1024 * 1024,
        ),
        cost_estimate=cost,
    )(cos_f, sin_f, x_f)

    out = out.reshape(B, N_pad, D)
    if N_pad != N:
        out = out[:, :N, :]
    return out


def rotary_embedding_ref(x, freqs_cos, freqs_sin):
    """Pure-JAX reference of the PyTorch forward (uses the RAW sin table)."""
    D = x.shape[-1]
    xp = x.reshape(x.shape[:-1] + (D // 2, 2))
    rt = jnp.stack((xp[..., 1], -xp[..., 0]), axis=-1).reshape(x.shape)
    return x * freqs_cos + rt * freqs_sin


if __name__ == "__main__":
    key = jax.random.PRNGKey(0)

    # Case 1: dim=16, size=8 -> N=64, D=32, B=2 (divisible fold, no padding).
    dim, size, B = 16, 8, 2
    N, D = size * size, 2 * dim
    cos, sin = make_rotary_tables(dim, size, ratio=0.5, theta=10000.0)
    cos_p, sin_signed = prepare_rotary_tables(cos, sin, dtype=jnp.float32)
    key, k1 = jax.random.split(key)
    x = jax.random.normal(k1, (B, N, D), dtype=jnp.float32)
    out = jax.block_until_ready(rotary_embedding(x, cos_p, sin_signed))
    ref = rotary_embedding_ref(x, cos, sin)
    assert out.shape == x.shape and out.dtype == x.dtype
    assert jnp.allclose(out, ref, atol=1e-5, rtol=1e-5)

    # Case 2: size=5 -> N=25 (no lane-dense divisor) exercises the padded path.
    dim2, size2, B2 = 16, 5, 2
    N2, D2 = size2 * size2, 2 * dim2
    cos2, sin2 = make_rotary_tables(dim2, size2, ratio=0.5, theta=10000.0)
    cos2_p, sin2_signed = prepare_rotary_tables(cos2, sin2, dtype=jnp.float32)
    key, k2 = jax.random.split(key)
    x2 = jax.random.normal(k2, (B2, N2, D2), dtype=jnp.float32)
    out2 = jax.block_until_ready(rotary_embedding(x2, cos2_p, sin2_signed))
    ref2 = rotary_embedding_ref(x2, cos2, sin2)
    assert out2.shape == x2.shape and out2.dtype == x2.dtype
    assert jnp.allclose(out2, ref2, atol=1e-5, rtol=1e-5)

    print("KERNEL_OK")
</pallas_src>

<mosaic_0001>
module attributes {stable_mosaic.version = 11 : i64} {
  func.func @_rope_kernel(%arg0: i32, %arg1: i32, %arg2: memref<1x2048xf32, #tpu.memory_space<vmem>>, %arg3: memref<1x2048xf32, #tpu.memory_space<vmem>>, %arg4: memref<1x1x2048xf32, #tpu.memory_space<vmem>>, %arg5: memref<1x1x2048xf32, #tpu.memory_space<vmem>>) attributes {dimension_semantics = [#tpu.dimension_semantics<arbitrary>, #tpu.dimension_semantics<parallel>], iteration_bounds = array<i64: 1, 2>, scalar_prefetch = 0 : i64, scratch_operands = 0 : i64, tpu.core_type = #tpu.core_type<tc>, window_params = [{transform_indices = @transform_0, window_bounds = array<i64: 1, 2048>}, {transform_indices = @transform_1, window_bounds = array<i64: 1, 2048>}, {transform_indices = @transform_2, window_bounds = array<i64: 1, 1, 2048>}, {transform_indices = @transform_3, window_bounds = array<i64: 1, 1, 2048>}]} {
    %c0 = arith.constant 0 : index
    %c0_0 = arith.constant 0 : index
    %c0_1 = arith.constant 0 : index
    %0 = vector.load %arg4[%c0, %c0_0, %c0_1] : memref<1x1x2048xf32, #tpu.memory_space<vmem>>, vector<1x1x2048xf32>
    %1 = vector.shape_cast %0 : vector<1x1x2048xf32> to vector<1x2048xf32>
    %c2047_i32 = arith.constant 2047 : i32
    %2 = tpu.dynamic_rotate %1 by %c2047_i32 dim 1 : vector<1x2048xf32>, i32 -> vector<1x2048xf32>
    %c1_i32 = arith.constant 1 : i32
    %3 = tpu.dynamic_rotate %1 by %c1_i32 dim 1 : vector<1x2048xf32>, i32 -> vector<1x2048xf32>
    %4 = tpu.iota {dimensions = array<i32: 1>} : vector<1x2048xi32>
    %c1_i32_2 = arith.constant 1 : i32
    %5 = vector.broadcast %c1_i32_2 : i32 to vector<1x2048xi32>
    %6 = arith.andi %4, %5 : vector<1x2048xi32>
    %c0_i32 = arith.constant 0 : i32
    %7 = vector.broadcast %c0_i32 : i32 to vector<1x2048xi32>
    %8 = arith.cmpi eq, %6, %7 : vector<1x2048xi32>
    %9 = arith.select %8, %2, %3 : vector<1x2048xi1>, vector<1x2048xf32>
    %c0_3 = arith.constant 0 : index
    %c0_4 = arith.constant 0 : index
    %10 = vector.load %arg2[%c0_3, %c0_4] : memref<1x2048xf32, #tpu.memory_space<vmem>>, vector<1x2048xf32>
    %11 = arith.mulf %1, %10 : vector<1x2048xf32>
    %c0_5 = arith.constant 0 : index
    %c0_6 = arith.constant 0 : index
    %12 = vector.load %arg3[%c0_5, %c0_6] : memref<1x2048xf32, #tpu.memory_space<vmem>>, vector<1x2048xf32>
    %13 = arith.mulf %9, %12 : vector<1x2048xf32>
    %14 = arith.addf %11, %13 : vector<1x2048xf32>
    %c0_7 = arith.constant 0 : index
    %c0_8 = arith.constant 0 : index
    %c0_9 = arith.constant 0 : index
    %15 = vector.load %arg5[%c0_7, %c0_8, %c0_9] : memref<1x1x2048xf32, #tpu.memory_space<vmem>>, vector<1x1x2048xf32>
    %16 = vector.shape_cast %15 : vector<1x1x2048xf32> to vector<1x2048xf32>
    %17 = vector.shape_cast %14 : vector<1x2048xf32> to vector<1x1x2048xf32>
    tpu.vector_store %arg5[%c0_7, %c0_8, %c0_9], %17 {strides = array<i32>} : memref<1x1x2048xf32, #tpu.memory_space<vmem>>, vector<1x1x2048xf32>,
    return
  }
  func.func @transform_0(%arg0: i32, %arg1: i32) -> (i32, i32) {
    %c0_i32 = arith.constant 0 : i32
    %c0_i32_0 = arith.constant 0 : i32
    return %arg0, %c0_i32 : i32, i32
  }
  func.func @transform_1(%arg0: i32, %arg1: i32) -> (i32, i32) {
    %c0_i32 = arith.constant 0 : i32
    %c0_i32_0 = arith.constant 0 : i32
    return %arg0, %c0_i32 : i32, i32
  }
  func.func @transform_2(%arg0: i32, %arg1: i32) -> (i32, i32, i32) {
    %c0_i32 = arith.constant 0 : i32
    %c0_i32_0 = arith.constant 0 : i32
    return %arg1, %arg0, %c0_i32 : i32, i32, i32
  }
  func.func @transform_3(%arg0: i32, %arg1: i32) -> (i32, i32, i32) {
    %c0_i32 = arith.constant 0 : i32
    %c0_i32_0 = arith.constant 0 : i32
    return %arg1, %arg0, %c0_i32 : i32, i32, i32
  }
}

</mosaic_0001>

<bundles_post_ra>
// kernel: tpu_custom_call.1
= control target key start
LH: loop header
LB: loop body
LE: loop exit
PB: predicated region body
PF: predicated region fallthrough
CT: control target
= control target key end

     0   :  { %8 = vsyncpa [#allocation3], 0  ;;  %s1774_s0 = inlined_call_operand.hbm [shape: f32[1,2048], index: 0, kind: input, shape index: {}]   ;;  %s1775_s1 = inlined_call_operand.hbm [shape: f32[1,2048], index: 1, kind: input, shape index: {}]   ;;  %s1776_s2 = inlined_call_operand.hbm [shape: f32[2,1,2048], index: 2, kind: input, shape index: {}]   ;;  %s1777_s3 = inlined_call_operand.hbm [shape: f32[2,1,2048], index: 3, kind: output, shape index: {}]  }
   0x1   :  { %9 = vsyncpa [#allocation6], 0 }
   0x2   :  { %10 = vsyncpa [#allocation4], 0 }
   0x3   :  { %12 = vsyncpa [#allocation4 + $0x1], 0  ;;  %s1151_s12 = smov 0   ;;  %s1153_s13 = smov 0  }
   0x4   :  { %s1155_s14 = smov 0   ;;  %s1157_s15 = smov 0  }
   0x5   :  { %s1159_s16 = smov 0   ;;  %s1161_s17 = smov 0  }
   0x6 LB: > { %s1182_s18 = sadd.s32 4294967295, %s1122_s17   ;;  %s840_s19 = sadd.s32 4294967294, %s1122_s17   ;;  %s1122_s17 = sphi %s1161_s17, %s18_s17   ;;  %s1118_s16 = sphi %s1159_s16, %s1830_s16   ;;  %s1114_s15 = sphi %s1157_s15, %s1829_s15   ;;  %s1110_s14 = sphi %s1155_s14, %s1828_s14   ;;  %s1106_s13 = sphi %s1153_s13, %s1827_s13   ;;  %s1102_s12 = sphi %s1151_s12, %s1826_s12  }
   0x7   : > { %p104_p0 = scmp.ne.s32.totalorder %s1106_s13, %s1102_s12  ;;  %p1778_p1 = scmp.eq.s32.totalorder %s1182_s18, 0 }
   0x8   : > { %p136_p3 = scmp.eq.s32.totalorder %s840_s19, 1  ;;  %p841_p5 = scmp.ge.s32.totalorder %s1122_s17, 1 }
   0x9   : > { %p1191_p4 = por %p1778_p1, %p104_p0  ;;  %p143_p7 = scmp.lt.s32.totalorder %s1122_s17, 3 }
   0xa   : > { %p1196_p6 = por %p136_p3, %p104_p0  ;;  %s1124_s23 = smov [#allocation2]  }
   0xb   : > { %s1781_s20 = scalar_select %p1191_p4, 1, 0 }
   0xc   : > { %s1782_s21 = scalar_select %p1196_p6, 1, 0 }
   0xd   : > { %p1201_p8 = pnand %p841_p5, %p143_p7  ;;  %s159_s24 = sshll.u32 %s1124_s23, 4  ;;  %s160_s24 = int_to_ptr.vmem [resolvable:$true] %s159_s24 }
   0xe   : > { %s1125_s25 = smov [#allocation5]   ;;  %s946_s30 = scalar_lea.hbm %s1774_s0, 256 }
   0xf   : > { %s1783_s22 = scalar_select %p1201_p8, 1, 0 }
  0x10   : > { %p872_p10 = pneg %p1201_p8  ;;  %s173_s26 = sshll.u32 %s1125_s25, 4  ;;  %s1214_s26 = int_to_ptr.vmem [resolvable:$true] %s173_s26 }
  0x11   : > { %p947_p12 = scmp.ne.s32.totalorder %s1774_s0, %s946_s30  ;;  %p953_p5 = scmp.lt.u32.totalorder %s946_s30, %s1774_s0 }
  0x12   : > { %p1210_p11 = pnand %p872_p10, %p1778_p1 }
  0x14   : > { %p948_p13 = pneg %p1210_p11 }
  0x16   : > { %p949_p0 = pnand %p948_p13, %p947_p12 }
  0x18   : > { %p950_p3 = pneg %p949_p0 }
  0x1a   : > { %p955_p7 = pnand %p953_p5, %p950_p3 }
  0x1c   : > { %958 = shalt.err (!%p955_p7)
}
  0x1d   : > { %s959_s8 = scalar_lea.vmem %s160_s24, 256  ;;  %p967_p2 = scmp.lt.s32.totalorder %s160_s24, %s160_s24 }
  0x1e   : > { %p960_p10 = scmp.ne.s32.totalorder %s160_s24, %s959_s8  ;;  %p968_p6 = scmp.lt.s32.totalorder %s959_s8, %s959_s8 }
  0x20   : > { %p962_p9 = pnand %p960_p10, %p948_p13  ;;  %p969_p4 = por %p968_p6, %p967_p2 }
  0x22   : > { %p963_p1 = pneg %p962_p9 }
  0x24   : > { %p970_p8 = pnand %p969_p4, %p963_p1 }
  0x26   : > { %973 = shalt.err (!%p970_p8)
}
  0x27   : > { %875 = dma.hbm_to_vmem [thread:$0]  (!%p1210_p11), %s1774_s0, 256, %s160_s24, [#allocation3]  }
  0x28   : > { %s974_s23 = scalar_lea.hbm %s1775_s1, 256 }
  0x29   : > { %p975_p9 = scmp.ne.s32.totalorder %s1775_s1, %s974_s23  ;;  %p981_p4 = scmp.lt.u32.totalorder %s974_s23, %s1775_s1 }
  0x2b   : > { %p977_p2 = pnand %p975_p9, %p948_p13 }
  0x2d   : > { %p978_p1 = pneg %p977_p2 }
  0x2f   : > { %p983_p6 = pnand %p981_p4, %p978_p1 }
  0x31   : > { %986 = shalt.err (!%p983_p6)
}
  0x32   : > { %s987_s24 = scalar_lea.vmem %s1214_s26, 256  ;;  %p995_p3 = scmp.lt.s32.totalorder %s1214_s26, %s1214_s26 }
  0x33   : > { %p988_p8 = scmp.ne.s32.totalorder %s1214_s26, %s987_s24  ;;  %p996_p5 = scmp.lt.s32.totalorder %s987_s24, %s987_s24 }
  0x35   : > { %p990_p12 = pnand %p988_p8, %p948_p13  ;;  %p997_p7 = por %p996_p5, %p995_p3 }
  0x37   : > { %p991_p0 = pneg %p990_p12 }
  0x39   : > { %p998_p10 = pnand %p997_p7, %p991_p0 }
  0x3b   : > { %1001 = shalt.err (!%p998_p10)
}
  0x3c   : > { %878 = dma.hbm_to_vmem [thread:$0]  (!%p1210_p11), %s1775_s1, 256, %s1214_s26, [#allocation6]  }
  0x3d   : > { %s27_s6 = sadd.s32 1, %s1118_s16  ;;  %s91_s7 = sadd.s32 1, %s1110_s14 }
  0x3e   : > { %p28_p13 = scmp.ge.s32.totalorder %s27_s6, 2  ;;  %p98_p9 = scmp.ne.s32.totalorder %s1110_s14, %s1106_s13 }
  0x3f   : > { %p99_p2 = scmp.eq.s32.totalorder %s1122_s17, 0  ;;  %p889_p1 = scmp.lt.s32.totalorder %s1122_s17, 2 }
  0x40   : > { %s1832_s6 = smov (%p28_p13, %s27_s6), 0  ;;  %p1785_p6 = scmp.eq.s32.totalorder %s1182_s18, 1 }
  0x41   : > { %p100_p4 = por %p99_p2, %p98_p9  ;;  %s86_s8 = ssub.s32 %s1118_s16, %s1832_s6 }
  0x42   : > { %p1273_p8 = por %p1785_p6, %p98_p9  ;;  %s184_s9 = sand.u32 1, %s1122_s17  }
  0x43   : > { %p89_p12 = scmp.eq.s32.totalorder %s86_s8, 0  ;;  %s186_s10 = sand.u32 1, %s1110_s14  }
  0x44   : > { %s858_s26 = sshll.u32 %s1118_s16, 8  ;;  %s845_s19 = sshll.u32 %s186_s10, 4 }
  0x45   : > { %s1283_s11 = scalar_select %p89_p12, %s1110_s14, %s91_s7  }
  0x46   : > { %s1288_s28 = scalar_lea.hbm %s1776_s2, %s858_s26  ;;  %p1290_p11 = pnand %p889_p1, %p100_p4 }
  0x47   : > { %s188_s30 = scalar_lea.vmem [#allocation7], %s845_s19  ;;  %s185_s4 = scalar_lea.sflag [#allocation3], %s184_s9 }
  0x48   : > { %s198_s24 = sshll.u32 %s188_s30, 4  ;;  %s1002_s5 = scalar_lea.hbm %s1288_s28, 256  ;;  %s1294_s24 = int_to_ptr.vmem [resolvable:$true] %s198_s24 }
  0x49   : > { %p1003_p0 = scmp.ne.s32.totalorder %s1288_s28, %s1002_s5  ;;  %p1004_p3 = pneg %p1290_p11 }
  0x4a   : > { %s1007_s10 = scalar_lea.hbm %s1776_s2, 512  ;;  %p1008_p10 = scmp.lt.u32.totalorder %s1288_s28, %s1776_s2 }
  0x4b   : > { %p1005_p5 = pnand %p1004_p3, %p1003_p0  ;;  %p1009_p13 = scmp.lt.u32.totalorder %s1007_s10, %s1002_s5 }
  0x4c   : > { %p1011_p2 = scmp.lt.u32.totalorder %s1002_s5, %s1288_s28 }
  0x4d   : > { %p1006_p7 = pneg %p1005_p5  ;;  %p1010_p9 = por %p1009_p13, %p1008_p10 }
  0x4f   : > { %p1012_p1 = por %p1011_p2, %p1010_p9 }
  0x51   : > { %p1013_p4 = pnand %p1012_p1, %p1006_p7 }
  0x53   : > { %1016 = shalt.err (!%p1013_p4)
}
  0x54   : > { %s1017_s9 = scalar_lea.vmem %s1294_s24, 256  ;;  %s1126_s19 = smov [#allocation7]  }
  0x55   : > { %p1018_p6 = scmp.ne.s32.totalorder %s1294_s24, %s1017_s9  ;;  %s1022_s25 = sshll.u32 %s1126_s19, 4  ;;  %s1023_s25 = int_to_ptr.vmem [resolvable:$false] %s1022_s25 }
  0x56   : > { %s1024_s30 = scalar_lea.vmem %s1023_s25, 512  ;;  %p1025_p5 = scmp.lt.s32.totalorder %s1294_s24, %s1023_s25 }
  0x57   : > { %p1020_p12 = pnand %p1018_p6, %p1004_p3  ;;  %p1026_p10 = scmp.lt.s32.totalorder %s1024_s30, %s1017_s9 }
  0x59   : > { %p1021_p0 = pneg %p1020_p12  ;;  %p1027_p13 = por %p1026_p10, %p1025_p5 }
  0x5b   : > { %p1028_p9 = pnand %p1027_p13, %p1021_p0 }
  0x5d   : > { %1031 = shalt.err (!%p1028_p9)
}
  0x5e   : > { %882 = dma.hbm_to_vmem [thread:$0]  (!%p1290_p11), %s1288_s28, 256, %s1294_s24, %s185_s4  }
  0x5f   : > { %p1788_p7 = scmp.ne.s32.totalorder %s1783_s22, 0 }
  0x60   : > { %p1789_p3 = scmp.eq.s32.totalorder (!%p1788_p7), %s1182_s18, 0 }
  0x61   : > { %207 = sbr.rel (%p1788_p7) target bundleno = 328 (0x148), region = 32 }
  0x68   : > { %1085 = dma.done.wait (%p1789_p3), [#allocation3], 256   ;;  %p1790_p2 = pmov %p1789_p3 }
  0x6a   : > { %1087 = vsyncadd (%p1790_p2), [#allocation3], 4294967040  ;;  %p1791_p1 = pmov %p1790_p2 }
  0x6c   : > { %1089 = dma.done.wait (%p1791_p1), [#allocation6], 256   ;;  %p1792_p4 = pmov %p1791_p1 }
  0x6d   : > { %s217_s28 = sand.u32 1, %s1182_s18   ;;  %s219_s29 = sand.u32 1, %s1106_s13  }
  0x6e   : > { %1091 = vsyncadd (%p1792_p4), [#allocation6], 4294967040  ;;  %s1335_s22 = sshll.u32 %s219_s29, 4  ;;  %s218_s24 = scalar_lea.sflag [#allocation3], %s217_s28 }
  0x6f   : > { %s221_s4 = scalar_lea.vmem [#allocation7], %s1335_s22  ;;  %p1793_p11 = scmp.ne.s32.totalorder %s1781_s20, 0 }
  0x71   : > { %1093 = dma.done.wait (%p1793_p11), %s218_s24, 256  }
  0x72   : > { %1095 = vsyncadd (%p1793_p11), %s218_s24, 4294967040  ;;  %v248_v0 = vlaneseq  ;;  %v1357_v6 = vld [vmem:[%s221_s4] sm:$0xff]  ;;  %s1127_s18 = smov 127   ;;  %v1393_v19 = vld [vmem:[%s221_s4 + $0x8] sm:$0xff]  ;;  %s1128_s20 = smov 1  }
  0x73   : > { %v1129_v46 = vmov 1966171168   ;;  %v1458_v52 = vld [vmem:[#allocation5] sm:$0xff]  ;;  %s859_s5 = sshll.u32 %s1114_s15, 8  ;;  %s243_s7 = scalar_lea.vmem [#allocation8], %s1335_s22 }
  0x74   : > { %v1343_v1 = vshrl.u32 %v248_v0, 7  ;;  %v1444_v40 = vand.u32 127, %v248_v0  ;;  %v616_v47 = vunpack.c.l.s4 %v1129_v46  ;;  %s732_s8 = sshll.u32 %s243_s7, 4  ;;  %s1724_s23 = scalar_lea.hbm %s1777_s3, %s859_s5  ;;  %s1726_s8 = int_to_ptr.vmem [resolvable:$true] %s732_s8 }
  0x75   : > { %s716_s9 = scalar_lea.sflag [#allocation4], %s219_s29  ;;  %s1032_s15 = scalar_lea.vmem %s1726_s8, 256 }
  0x76   : > { %v1346_v2 = vsub.s32 2, %v1343_v1  ;;  %v1349_v3 = vsub.s32 0, %v1343_v1  ;;  %v1352_v4 = vsub.s32 3, %v1343_v1  ;;  %v1355_v5 = vsub.s32 1, %v1343_v1  ;;  %p1033_p6 = scmp.ne.s32.totalorder %s1726_s8, %s1032_s15  ;;  %s1130_s19 = smov [#allocation8]  }
  0x77   : > { %v1370_v11 = vsub.s32 5, %v1343_v1  ;;  %v1373_v12 = vsub.s32 4, %v1343_v1  ;;  %v1382_v15 = vsub.s32 7, %v1343_v1  ;;  %v1385_v16 = vsub.s32 6, %v1343_v1  ;;  %s1036_s25 = sshll.u32 %s1130_s19, 4  ;;  %s1037_s25 = int_to_ptr.vmem [resolvable:$false] %s1036_s25 }
  0x78   : > { %v259_v7 = vrot.slane %v1357_v6, %v1346_v2  ;;  %v251_v8 = vrot.slane %v1357_v6, %v1349_v3  ;;  %v263_v9 = vrot.slane %v1357_v6, %v1352_v4  ;;  %v255_v10 = vrot.slane %v1357_v6, %v1355_v5  ;;  %p1034_p12 = pnand %p1033_p6, %p1273_p8  ;;  %s1038_s30 = scalar_lea.vmem %s1037_s25, 512 }
  0x79   : > { %v271_v13 = vrot.slane %v1357_v6, %v1370_v11  ;;  %v267_v14 = vrot.slane %v1357_v6, %v1373_v12  ;;  %v279_v17 = vrot.slane %v1357_v6, %v1382_v15  ;;  %v275_v18 = vrot.slane %v1357_v6, %v1385_v16  ;;  %p1039_p5 = scmp.lt.s32.totalorder %s1726_s8, %s1037_s25  ;;  %p1040_p10 = scmp.lt.s32.totalorder %s1038_s30, %s1032_s15 }
  0x7a   : > { %332 = vrot.lane.b32.xlu1 %v259_v7, %s1127_s18  ;;  %328 = vrot.lane.b32.xlu0 %v251_v8, %s1127_s18  ;;  %v287_v20 = vrot.slane %v1393_v19, %v1355_v5  ;;  %v283_v21 = vrot.slane %v1393_v19, %v1349_v3  ;;  %v295_v22 = vrot.slane %v1393_v19, %v1352_v4  ;;  %v428_v41 = vadd.s32 128, %v1444_v40  ;;  %p1035_p0 = pneg %p1034_p12 }
  0x7b   : > { %v291_v23 = vrot.slane %v1393_v19, %v1346_v2  ;;  %v303_v24 = vrot.slane %v1393_v19, %v1370_v11  ;;  %v299_v25 = vrot.slane %v1393_v19, %v1373_v12  ;;  %v311_v26 = vrot.slane %v1393_v19, %v1382_v15  ;;  %p1041_p13 = por %p1040_p10, %p1039_p5 }
  0x7c   : > { %v307_v27 = vrot.slane %v1393_v19, %v1385_v16  ;;  %v429_v44 = vadd.s32 256, %v1444_v40  ;;  %v430_v45 = vadd.s32 384, %v1444_v40  ;;  %v431_v48 = vadd.s32 512, %v1444_v40 }
  0x7d   : > { %v444_v49 = vand.u32 1, %v428_v41  ;;  %v432_v54 = vadd.s32 640, %v1444_v40  ;;  %vm362_vm0 = vcmp.lt.s32.totalorder %v1444_v40, 127  ;;  %v617_v56 = vunpack.c.0.s8 %v616_v47  ;;  %p1042_p9 = pnand %p1041_p13, %p1035_p0 }
  0x7e   : > { %334 = vrot.lane.b32.xlu1 %v263_v9, %s1127_s18  ;;  %330 = vrot.lane.b32.xlu0 %v255_v10, %s1127_s18  ;;  %v445_v53 = vand.u32 1, %v429_v44  ;;  %v446_v55 = vand.u32 1, %v430_v45  ;;  %vm411_vm1 = vcmp.lt.s32.totalorder %v1444_v40, 1  ;;  %v447_v57 = vand.u32 1, %v431_v48 }
  0x7f   : > { %v433_v58 = vadd.s32 768, %v1444_v40  ;;  %v434_v59 = vadd.s32 896, %v1444_v40  ;;  %vm1465_vm2 = vcmp.eq.s32.totalorder %v444_v49, 0  ;;  %v506_v61 = vrot.slane %v1458_v52, %v1355_v5 }
  0x80   : > { %v435_v62 = vadd.s32 1024, %v1444_v40  ;;  %v436_v63 = vadd.s32 1152, %v1444_v40  ;;  %vm1475_vm3 = vcmp.eq.s32.totalorder %v445_v53, 0  ;;  %vm1490_vm4 = vcmp.eq.s32.totalorder %v446_v55, 0 }
  0x81   : > { %vm1499_vm5 = vcmp.eq.s32.totalorder %v447_v57, 0  ;;  %v522_v46 = vrot.slane %v1458_v52, %v1370_v11  ;;  %v526_v47 = vrot.slane %v1458_v52, %v1385_v16  ;;  %v530_v48 = vrot.slane %v1458_v52, %v1382_v15 }
  0x82   : > { %338 = vrot.lane.b32.xlu1 %v271_v13, %s1127_s18  ;;  %336 = vrot.lane.b32.xlu0 %v267_v14, %s1127_s18  ;;  %v452_v41 = vand.u32 1, %v436_v63 }
  0x84   : > { %vm1543_vm10 = vcmp.eq.s32.totalorder %v452_v41, 0 }
  0x86   : > { %342 = vrot.lane.b32.xlu1 %v279_v17, %s1127_s18  ;;  %340 = vrot.lane.b32.xlu0 %v275_v18, %s1127_s18 }
  0x8a   : > { %346 = vrot.lane.b32.xlu1 %v287_v20, %s1127_s18  ;;  %344 = vrot.lane.b32.xlu0 %v283_v21, %s1127_s18 }
  0x8e   : > { %350 = vrot.lane.b32.xlu1 %v295_v22, %s1127_s18  ;;  %348 = vrot.lane.b32.xlu0 %v291_v23, %s1127_s18 }
  0x92   : > { %354 = vrot.lane.b32.xlu1 %v303_v24, %s1127_s18  ;;  %352 = vrot.lane.b32.xlu0 %v299_v25, %s1127_s18 }
  0x96   : > { %358 = vrot.lane.b32.xlu1 %v311_v26, %s1127_s18  ;;  %356 = vrot.lane.b32.xlu0 %v307_v27, %s1127_s18 }
  0x9a   : > { %381 = vrot.lane.b32.xlu1 %v255_v10, %s1128_s20  ;;  %379 = vrot.lane.b32.xlu0 %v251_v8, %s1128_s20  ;;  %v514_v10 = vrot.slane %v1458_v52, %v1352_v4 }
  0x9e   : > { %385 = vrot.lane.b32.xlu1 %v263_v9, %s1128_s20  ;;  %383 = vrot.lane.b32.xlu0 %v259_v7, %s1128_s20  ;;  %v510_v9 = vrot.slane %v1458_v52, %v1346_v2 }
  0xa2   : > { %389 = vrot.lane.b32.xlu1 %v271_v13, %s1128_s20  ;;  %387 = vrot.lane.b32.xlu0 %v267_v14, %s1128_s20  ;;  %v448_v13 = vand.u32 1, %v432_v54 }
  0xa4   : > { %vm1507_vm6 = vcmp.eq.s32.totalorder %v448_v13, 0  ;;  %v439_v13 = vadd.s32 1536, %v1444_v40 }
  0xa6   : > { %393 = vrot.lane.b32.xlu1 %v279_v17, %s1128_s20  ;;  %391 = vrot.lane.b32.xlu0 %v275_v18, %s1128_s20 }
  0xaa   : > { %397 = vrot.lane.b32.xlu1 %v287_v20, %s1128_s20  ;;  %395 = vrot.lane.b32.xlu0 %v283_v21, %s1128_s20  ;;  %v1495_v20 = vsub.s32 %v617_v56, %v1343_v1 }
  0xae   : > { %401 = vrot.lane.b32.xlu1 %v295_v22, %s1128_s20  ;;  %399 = vrot.lane.b32.xlu0 %v291_v23, %s1128_s20  ;;  %v449_v23 = vand.u32 1, %v433_v58 }
  0xb0   : > { %vm1531_vm7 = vcmp.eq.s32.totalorder %v449_v23, 0 }
  0xb2   : > { %405 = vrot.lane.b32.xlu1 %v303_v24, %s1128_s20  ;;  %403 = vrot.lane.b32.xlu0 %v299_v25, %s1128_s20  ;;  %v450_v24 = vand.u32 1, %v434_v59 }
  0xb4   : > { %vm1535_vm8 = vcmp.eq.s32.totalorder %v450_v24, 0 }
  0xb6   : > { %409 = vrot.lane.b32.xlu1 %v311_v26, %s1128_s20  ;;  %407 = vrot.lane.b32.xlu0 %v307_v27, %s1128_s20  ;;  %v518_v26 = vrot.slane %v1458_v52, %v1373_v12  ;;  %v451_v27 = vand.u32 1, %v435_v62  ;;  %v1547_v62 = vld [vmem:[#allocation5 + $0x8] sm:$0xff] }
  0xb7   : > { %v534_v24 = vrot.slane %v1547_v62, %v1349_v3 }
  0xb8   : > { %vm1539_vm9 = vcmp.eq.s32.totalorder %v451_v27, 0  ;;  %v440_v27 = vadd.s32 1664, %v1444_v40 }
  0xec   : > { %v1421_v28 = vpop.permute.xlu1 %332  ;;  %v1423_v29 = vpop.permute.xlu0 %328 }
  0xf0   : > { %v335_v30 = vpop.permute.xlu1 %334  ;;  %v1425_v31 = vpop.permute.xlu0 %330 }
  0xf1   : > { %v376_v14 = vsel %vm362_vm0, %v1425_v31, %v1421_v28  ;;  %v375_v49 = vsel %vm362_vm0, %v1421_v28, %v335_v30 }
  0xf4   : > { %v1427_v32 = vpop.permute.xlu1 %338  ;;  %v1429_v33 = vpop.permute.xlu0 %336 }
  0xf5   : > { %v374_v53 = vsel %vm362_vm0, %v335_v30, %v1429_v33  ;;  %v373_v63 = vsel %vm362_vm0, %v1429_v33, %v1427_v32 }
  0xf8   : > { %v1431_v34 = vpop.permute.xlu1 %342  ;;  %v1433_v35 = vpop.permute.xlu0 %340 }
  0xf9   : > { %v371_v22 = vsel %vm362_vm0, %v1433_v35, %v1431_v34 }
  0xfc   : > { %v1435_v36 = vpop.permute.xlu1 %346  ;;  %v1437_v37 = vpop.permute.xlu0 %344 }
  0xfd   : > { %v369_v58 = vsel %vm362_vm0, %v1437_v37, %v1435_v36 }
 0x100   : > { %v1439_v38 = vpop.permute.xlu1 %350  ;;  %v1441_v39 = vpop.permute.xlu0 %348 }
 0x101   : > { %v367_v60 = vsel %vm362_vm0, %v1441_v39, %v1439_v38 }
 0x104   : > { %v1447_v42 = vpop.permute.xlu1 %354  ;;  %v1449_v43 = vpop.permute.xlu0 %352 }
 0x108   : > { %v1454_v50 = vpop.permute.xlu1 %358  ;;  %v1456_v51 = vpop.permute.xlu0 %356 }
 0x10c   : > { %v382_v0 = vpop.permute.xlu1 %381  ;;  %v1473_v7 = vpop.permute.xlu0 %379 }
 0x10d   : > { %v426_v17 = vsel %vm411_vm1, %v1473_v7, %v382_v0 }
 0x10e   : > { %v476_v21 = vsel %vm1465_vm2, %v376_v14, %v426_v17  ;;  %v372_v14 = vsel %vm362_vm0, %v1427_v32, %v1433_v35 }
 0x10f   : > { %v1503_v25 = vmul.f32 %v506_v61, %v476_v21  ;;  %v366_v61 = vsel %vm362_vm0, %v1439_v38, %v1449_v43 }
 0x110   : > { %v386_v44 = vpop.permute.xlu1 %385  ;;  %v384_v45 = vpop.permute.xlu0 %383 }
 0x111   : > { %v424_v54 = vsel %vm411_vm1, %v384_v45, %v386_v44  ;;  %v425_v55 = vsel %vm411_vm1, %v382_v0, %v384_v45 }
 0x112   : > { %v477_v56 = vsel %vm1475_vm3, %v375_v49, %v425_v55  ;;  %v478_v57 = vsel %vm1490_vm4, %v374_v53, %v424_v54  ;;  %v538_v49 = vrot.slane %v1547_v62, %v1355_v5  ;;  %v455_v55 = vand.u32 1, %v439_v13 }
 0x113   : > { %v581_v30 = vmul.f32 %v510_v9, %v477_v56  ;;  %v582_v59 = vmul.f32 %v514_v10, %v478_v57  ;;  %v437_v9 = vadd.s32 1280, %v1444_v40  ;;  %v438_v10 = vadd.s32 1408, %v1444_v40 }
 0x114   : > { %v390_v0 = vpop.permute.xlu1 %389  ;;  %v388_v8 = vpop.permute.xlu0 %387  ;;  %v370_v56 = vsel %vm362_vm0, %v1431_v34, %v1437_v37  ;;  %vm1609_vm13 = vcmp.eq.s32.totalorder %v455_v55, 0 }
 0x115   : > { %v612_v17 = vcombine.low %v581_v30, %v582_v59  ;;  %v422_v18 = vsel %vm411_vm1, %v388_v8, %v390_v0  ;;  %v423_v33 = vsel %vm411_vm1, %v386_v44, %v388_v8  ;;  %v453_v53 = vand.u32 1, %v437_v9 }
 0x116   : > { %v479_v21 = vsel %vm1499_vm5, %v373_v63, %v423_v33  ;;  %v480_v23 = vsel %vm1507_vm6, %v372_v14, %v422_v18  ;;  %v454_v54 = vand.u32 1, %v438_v10  ;;  %v542_v30 = vrot.slane %v1547_v62, %v1346_v2 }
 0x117   : > { %v1572_v32 = vrot.slane %v612_v17, %v1495_v20  ;;  %v583_v41 = vmul.f32 %v518_v26, %v479_v21  ;;  %v584_v45 = vmul.f32 %v522_v46, %v480_v23  ;;  %v456_v59 = vand.u32 1, %v440_v27 }
 0x118   : > { %v394_v44 = vpop.permute.xlu1 %393  ;;  %v392_v1 = vpop.permute.xlu0 %391  ;;  %v546_v9 = vrot.slane %v1547_v62, %v1352_v4  ;;  %vm1601_vm11 = vcmp.eq.s32.totalorder %v453_v53, 0  ;;  %vm1605_vm12 = vcmp.eq.s32.totalorder %v454_v54, 0  ;;  %v368_v4 = vsel %vm362_vm0, %v1435_v36, %v1441_v39 }
 0x119   : > { %v613_v26 = vcombine.low %v583_v41, %v584_v45  ;;  %v420_v46 = vsel %vm411_vm1, %v392_v1, %v394_v44  ;;  %v421_v5 = vsel %vm411_vm1, %v390_v0, %v392_v1  ;;  %vm1625_vm14 = vcmp.eq.s32.totalorder %v456_v59, 0 }
 0x11a   : > { %v481_v35 = vsel %vm1531_vm7, %v371_v22, %v421_v5  ;;  %v482_v57 = vsel %vm1535_vm8, %v370_v56, %v420_v46  ;;  %v442_v33 = vadd.s32 1920, %v1444_v40  ;;  %v550_v27 = vrot.slane %v1547_v62, %v1373_v12 }
 0x11b   : > { %v635_v63 = vrot.slane %v613_v26, %v1495_v20  ;;  %v585_v34 = vmul.f32 %v526_v47, %v481_v35  ;;  %v586_v8 = vmul.f32 %v530_v48, %v482_v57  ;;  %v443_v22 = vand.u32 1, %v1444_v40 }
 0x11c   : > { %v398_v0 = vpop.permute.xlu1 %397  ;;  %v396_v10 = vpop.permute.xlu0 %395  ;;  %v554_v53 = vrot.slane %v1547_v62, %v1370_v11  ;;  %v458_v54 = vand.u32 1, %v442_v33  ;;  %v365_v5 = vsel %vm362_vm0, %v1449_v43, %v1447_v42  ;;  %v364_v11 = vsel %vm362_vm0, %v1447_v42, %v1456_v51 }
 0x11d   : > { %v614_v37 = vcombine.low %v585_v34, %v586_v8  ;;  %v418_v48 = vsel %vm411_vm1, %v396_v10, %v398_v0  ;;  %v419_v13 = vsel %vm411_vm1, %v394_v44, %v396_v10  ;;  %vm1659_vm15 = vcmp.eq.s32.totalorder %v443_v22, 0 }
 0x11e   : > { %v483_v14 = vsel %vm1539_vm9, %v369_v58, %v419_v13  ;;  %v484_v17 = vsel %vm1543_vm10, %v368_v4, %v418_v48  ;;  %v502_v58 = vrot.slane %v1458_v52, %v1349_v3  ;;  %vm1680_vm2 = vcmp.eq.s32.totalorder %v458_v54, 0 }
 0x11f   : > { %v642_v36 = vrot.slane %v614_v37, %v1495_v20  ;;  %v587_v21 = vmul.f32 %v534_v24, %v483_v14  ;;  %v588_v23 = vmul.f32 %v538_v49, %v484_v17  ;;  %v441_v24 = vadd.s32 1792, %v1444_v40 }
 0x120   : > { %v402_v41 = vpop.permute.xlu1 %401  ;;  %v400_v45 = vpop.permute.xlu0 %399  ;;  %v377_v47 = vsel %vm362_vm0, %v1423_v29, %v1425_v31  ;;  %v378_v3 = vsel %vm362_vm0, %v1454_v50, %v1423_v29  ;;  %v363_v29 = vsel %vm362_vm0, %v1456_v51, %v1454_v50 }
 0x121   : > { %v644_v49 = vcombine.low %v635_v63, %v642_v36  ;;  %v660_v44 = vcombine.low %v587_v21, %v588_v23  ;;  %v416_v12 = vsel %vm411_vm1, %v400_v45, %v402_v41  ;;  %v417_v1 = vsel %vm411_vm1, %v398_v0, %v400_v45 }
 0x122   : > { %v485_v39 = vsel %vm1601_vm11, %v367_v60, %v417_v1  ;;  %v486_v38 = vsel %vm1605_vm12, %v366_v61, %v416_v12  ;;  %v457_v63 = vand.u32 1, %v441_v24  ;;  %v558_v0 = vrot.slane %v1547_v62, %v1385_v16  ;;  %v492_v61 = vld [vmem:[#allocation2 + $0x8] sm:$0xff] }
 0x123   : > { %v658_v55 = vrot.slane %v644_v49, %v1495_v20  ;;  %v670_v56 = vrot.slane %v660_v44, %v1495_v20  ;;  %v589_v26 = vmul.f32 %v542_v30, %v485_v39  ;;  %v590_v46 = vmul.f32 %v546_v9, %v486_v38 }
 0x124   : > { %v406_v35 = vpop.permute.xlu1 %405  ;;  %v404_v57 = vpop.permute.xlu0 %403  ;;  %vm473_vm3 = vcmp.eq.s32.totalorder %v457_v63, 0  ;;  %v562_v16 = vrot.slane %v1547_v62, %v1382_v15 }
 0x125   : > { %v661_v34 = vcombine.low %v589_v26, %v590_v46  ;;  %v414_v30 = vsel %vm411_vm1, %v404_v57, %v406_v35  ;;  %v415_v8 = vsel %vm411_vm1, %v402_v41, %v404_v57 }
 0x126   : > { %v487_v43 = vsel %vm1609_vm13, %v365_v5, %v415_v8  ;;  %v488_v9 = vsel %vm1625_vm14, %v364_v11, %v414_v30 }
 0x127   : > { %v677_v42 = vrot.slane %v661_v34, %v1495_v20  ;;  %v591_v10 = vmul.f32 %v550_v27, %v487_v43  ;;  %v592_v28 = vmul.f32 %v554_v53, %v488_v9  ;;  %v491_v27 = vld [vmem:[#allocation2] sm:$0xff] }
 0x128   : > { %v410_v52 = vpop.permute.xlu1 %409  ;;  %v408_v4 = vpop.permute.xlu0 %407  ;;  %v493_v22 = vmul.f32 %v491_v27, %v1357_v6 }
 0x129   : > { %v692_v37 = vcombine.low %v670_v56, %v677_v42  ;;  %v662_v48 = vcombine.low %v591_v10, %v592_v28  ;;  %v427_v13 = vsel %vm411_vm1, %v410_v52, %v1473_v7  ;;  %v412_v31 = vsel %vm411_vm1, %v408_v4, %v410_v52 }
 0x12a   : > { %v475_v14 = vsel %vm1659_vm15, %v377_v47, %v427_v13  ;;  %v413_v15 = vsel %vm411_vm1, %v406_v35, %v408_v4  ;;  %v490_v62 = vsel %vm1680_vm2, %v378_v3, %v412_v31 }
 0x12b   : > { %v700_v17 = vrot.slane %v692_v37, %v1495_v20  ;;  %v684_v7 = vrot.slane %v662_v48, %v1495_v20  ;;  %v579_v18 = vmul.f32 %v502_v58, %v475_v14  ;;  %v489_v33 = vsel %vm473_vm3, %v363_v29, %v413_v15 }
 0x12c   : > { %v593_v36 = vmul.f32 %v558_v0, %v489_v33  ;;  %v594_v21 = vmul.f32 %v562_v16, %v490_v62 }
 0x12d   : > { %v611_v50 = vcombine.low %v579_v18, %v1503_v25  ;;  %v494_v25 = vmul.f32 %v492_v61, %v1393_v19 }
 0x12e   : > { %v663_v51 = vcombine.low %v593_v36, %v594_v21 }
 0x12f   : > { %v621_v23 = vrot.slane %v611_v50, %v1495_v20 }
 0x130   : > { %v691_v40 = vrot.slane %v663_v51, %v1495_v20 }
 0x131   : > { %v643_v60 = vcombine.low %v621_v23, %v1572_v32 }
 0x132   : > { %v693_v41 = vcombine.low %v684_v7, %v691_v40 }
 0x133   : > { %v651_v45 = vrot.slane %v643_v60, %v1495_v20 }
 0x134   : > { %v707_v24 = vrot.slane %v693_v41, %v1495_v20 }
 0x135   : > { %v659_v49 = vcombine.low %v651_v45, %v658_v55 }
 0x136   : > { %v708_v44 = vcombine.low %v700_v17, %v707_v24 }
 0x137   : > { %v711_v12 = vadd.f32 %v659_v49, %v493_v22 }
 0x138   : > { %v712_v1 = vadd.f32 %v708_v44, %v494_v25 }
 0x139   : > { %713 = vst [vmem:[%s243_s7] sm:$0xff] %v711_v12 }
 0x13a   : > { %714 = vst [vmem:[%s243_s7 + $0x8] sm:$0xff] %v712_v1 }
 0x13b   : > { %1045 = shalt.err (!%p1042_p9)
}
 0x13c   : > { %s1046_s28 = scalar_lea.hbm %s1724_s23, 256  ;;  %s1050_s24 = scalar_lea.hbm %s1777_s3, 512 }
 0x13d   : > { %p1047_p7 = scmp.ne.s32.totalorder %s1724_s23, %s1046_s28  ;;  %p1051_p1 = scmp.lt.u32.totalorder %s1724_s23, %s1777_s3 }
 0x13e   : > { %p1052_p4 = scmp.lt.u32.totalorder %s1050_s24, %s1046_s28  ;;  %p1054_p6 = scmp.lt.u32.totalorder %s1046_s28, %s1724_s23 }
 0x13f   : > { %p1048_p3 = pnand %p1047_p7, %p1273_p8 }
 0x140   : > { %p1053_p11 = por %p1052_p4, %p1051_p1 }
 0x141   : > { %p1049_p2 = pneg %p1048_p3 }
 0x142   : > { %p1055_p12 = por %p1054_p6, %p1053_p11 }
 0x144   : > { %p1056_p0 = pnand %p1055_p12, %p1049_p2 }
 0x146   : > { %1059 = shalt.err (!%p1056_p0)
}
 0x147   : > { %870 = dma.vmem_to_hbm [thread:$0]  (%p1273_p8), %s1726_s8, 256, %s1724_s23, %s716_s9  }
 0x148 PF: > { %s744_s20 = sand.u32 1, %s1102_s12   ;;  %p1824_p5 = scmp.ne.s32.totalorder %s1782_s21, 0 }
 0x149   : > { %p1825_p10 = scmp.ge.s32.totalorder %s1122_s17, 2  ;;  %s745_s5 = scalar_lea.sflag [#allocation4], %s744_s20 }
 0x14b   : > { %p884_p13 = pnand %p1825_p10, %p1824_p5 }
 0x14d   : > { %1097 = dma.done.wait (!%p884_p13), %s745_s5, 256  }
 0x14e   : > { %1099 = vsyncadd (!%p884_p13), %s745_s5, 4294967040  ;;  %s18_s17 = sadd.s32 1, %s1122_s17   ;;  %s1826_s12 = smov %s1106_s13 }
 0x14f   : > { %p15_p9 = scmp.ge.s32.totalorder %s18_s17, 4   ;;  %s1827_s13 = smov %s1110_s14 }
 0x150   : > { %s1828_s14 = smov %s1283_s11  ;;  %s1829_s15 = smov %s1118_s16 }
 0x151   : > { %s1830_s16 = smov %s1832_s6  ;;  %17 = sbr.rel (!%p15_p9) target bundleno = 6 (0x6), region = 86 }
 0x158   :  { %750 = vsyncpa [#allocation3], 1 }
 0x159   :  { %752 = vsyncpa [#allocation3 + $0x1], 1 }
 0x15a   :  { %753 = vsyncpa [#allocation6], 1 }
 0x15b   :  { %754 = vsyncpa [#allocation4], 1 }
 0x15c   :  { %756 = vsyncpa [#allocation4 + $0x1], 1 }

</bundles_post_ra>
